<compile_context>
chip_gen: v5e
topology: v5e:2x2
jax: 0.10.0
libtpu: 0.0.40
codegen_flags: <defaults>
</compile_context>

<pallas_src>
import functools

import jax
import jax.numpy as jnp
from jax import lax
from jax.experimental import pallas as pl
from jax.experimental.pallas import tpu as pltpu

LANE = 128


def _cdiv(a, b):
    return -(-a // b)


def _vmem_capacity_bytes():
    try:
        return int(pltpu.get_tpu_info().vmem_capacity_bytes)
    except Exception:
        return 64 << 20  # conservative fallback (v7x per-core VMEM)


def _pick_tiles(C, OC, S, x_itemsize, conv_itemsize):
    """VMEM-aware spatial tile width and scoped-VMEM limit."""
    vmem_cap = _vmem_capacity_bytes()
    budget = vmem_cap // 4  # per-pass, double-buffered working-set target
    # Bytes per spatial column (double buffered), worst of the two passes.
    per_col = max(2 * (C + OC) * conv_itemsize,            # conv pass
                  2 * C * (x_itemsize + conv_itemsize))    # pool (+fused cast)
    max_cols = max(LANE, budget // per_col)
    if S <= max_cols:
        # Whole spatial extent in one tile (block dim == full array dim is
        # always legal; no tail masking needed).
        s_tile = S
    else:
        # Multi-tile: 128-aligned (prefer 512), never wider than the data so
        # the partial tail block stays within the array extent.
        s_tile = min(max_cols, 32768, (S // LANE) * LANE)
        if s_tile >= 512:
            s_tile = (s_tile // 512) * 512
        s_tile = max(LANE, s_tile)
    vmem_limit = vmem_cap // 2  # comfortably above working set, below physical
    return int(s_tile), int(vmem_limit)


# ---------------- Pass 1: global average pool (channel sums) ----------------

def _pool_accumulate(x_raw, sum_ref, *, s_total, s_tile, mask_tail):
    s = pl.program_id(1)

    @pl.when(s == 0)
    def _():
        sum_ref[...] = jnp.zeros_like(sum_ref)

    x = x_raw.astype(jnp.float32)
    if mask_tail:
        # Zero the out-of-bounds columns of the ragged tail tile (Pallas
        # leaves them with unspecified data).
        col = lax.broadcasted_iota(jnp.int32, x.shape, 1) + s * s_tile
        x = jnp.where(col < s_total, x, 0.0)
    sum_ref[...] += jnp.sum(x, axis=1, keepdims=True)


def _pool_kernel(x_ref, sum_ref, *, s_total, s_tile, mask_tail):
    _pool_accumulate(x_ref[...], sum_ref, s_total=s_total, s_tile=s_tile,
                     mask_tail=mask_tail)


def _pool_cast_kernel(x_ref, sum_ref, xcast_ref, *, s_total, s_tile, mask_tail):
    x_raw = x_ref[...]
    # Fused downcast: the tile is already in VMEM, so the cast is hidden under
    # the DMA.  Garbage in the tail columns is clipped on the partial-block
    # writeback and never consumed.
    xcast_ref[...] = x_raw.astype(xcast_ref.dtype)
    _pool_accumulate(x_raw, sum_ref, s_total=s_total, s_tile=s_tile,
                     mask_tail=mask_tail)


def _pool_pass(x, s_tile, vmem_limit, cast_dtype):
    """Channel sums (N, C); optionally also a cast copy of x for the conv."""
    N, C, S = x.shape
    n_s = _cdiv(S, s_tile)
    mask_tail = (S % s_tile) != 0

    x_spec = pl.BlockSpec((None, C, s_tile), lambda n, s: (n, 0, s))
    sum_spec = pl.BlockSpec((None, C, 1), lambda n, s: (n, 0, 0))
    sum_shape = jax.ShapeDtypeStruct((N, C, 1), jnp.float32)
    params = pltpu.CompilerParams(
        dimension_semantics=("parallel", "arbitrary"),
        vmem_limit_bytes=vmem_limit)
    x_bytes = x.size * x.dtype.itemsize

    if cast_dtype is None:
        sums = pl.pallas_call(
            functools.partial(_pool_kernel, s_total=S, s_tile=s_tile,
                              mask_tail=mask_tail),
            out_shape=sum_shape,
            grid_spec=pltpu.PrefetchScalarGridSpec(
                num_scalar_prefetch=0, grid=(N, n_s),
                in_specs=[x_spec], out_specs=sum_spec),
            compiler_params=params,
            cost_estimate=pl.CostEstimate(
                flops=N * C * S, transcendentals=0,
                bytes_accessed=x_bytes + N * C * 4),
        )(x)
        return sums[:, :, 0], x

    cast_bytes = N * C * S * jnp.dtype(cast_dtype).itemsize
    sums, x_cast = pl.pallas_call(
        functools.partial(_pool_cast_kernel, s_total=S, s_tile=s_tile,
                          mask_tail=mask_tail),
        out_shape=(sum_shape, jax.ShapeDtypeStruct((N, C, S), cast_dtype)),
        grid_spec=pltpu.PrefetchScalarGridSpec(
            num_scalar_prefetch=0, grid=(N, n_s),
            in_specs=[x_spec],
            out_specs=(sum_spec,
                       pl.BlockSpec((None, C, s_tile), lambda n, s: (n, 0, s)))),
        compiler_params=params,
        cost_estimate=pl.CostEstimate(
            flops=N * C * S, transcendentals=0,
            bytes_accessed=x_bytes + cast_bytes + N * C * 4),
    )(x)
    return sums[:, :, 0], x_cast


# ---------------- Pass 2: gate-folded 1x1x1 conv ----------------

def _conv_kernel(wg_ref, x_ref, b_ref, o_ref):
    # wg_ref: (OC, C) gate-folded conv weight for this batch element.
    # x_ref : (C, s_tile) activation tile.
    # b_ref : (OC, 1) bias (f32).
    # o_ref : (OC, s_tile) lane-dense output tile (partial tail clipped by
    #         Pallas on writeback).
    out = jnp.dot(wg_ref[...], x_ref[...], preferred_element_type=jnp.float32)
    o_ref[...] = (out + b_ref[...]).astype(o_ref.dtype)


def _gated_conv(x, wg, b2, s_tile, vmem_limit, out_dtype):
    N, C, S = x.shape
    OC = wg.shape[1]
    n_s = _cdiv(S, s_tile)

    flops = 2 * N * OC * C * S
    bytes_accessed = (x.size * x.dtype.itemsize
                      + wg.size * wg.dtype.itemsize
                      + N * OC * S * jnp.dtype(out_dtype).itemsize)

    return pl.pallas_call(
        _conv_kernel,
        out_shape=jax.ShapeDtypeStruct((N, OC, S), out_dtype),
        grid_spec=pltpu.PrefetchScalarGridSpec(
            num_scalar_prefetch=0,
            grid=(N, n_s),
            in_specs=[
                # Per-batch folded weight: resident across the spatial axis.
                pl.BlockSpec((None, OC, C), lambda n, s: (n, 0, 0)),
                # Streaming activation tile.
                pl.BlockSpec((None, C, s_tile), lambda n, s: (n, 0, s)),
                # Bias: constant.
                pl.BlockSpec((OC, 1), lambda n, s: (0, 0)),
            ],
            out_specs=pl.BlockSpec((None, OC, s_tile), lambda n, s: (n, 0, s)),
        ),
        compiler_params=pltpu.CompilerParams(
            dimension_semantics=("parallel", "parallel"),
            vmem_limit_bytes=vmem_limit),
        cost_estimate=pl.CostEstimate(
            flops=flops, transcendentals=0, bytes_accessed=bytes_accessed),
    )(wg, x, b2)


# ---------------- Public wrapper ----------------

@functools.partial(jax.jit, static_argnames=("conv_dtype", "s_tile"))
def se_block(x_ncdhw, w1, w2, wc, bc, *, conv_dtype=jnp.float32, s_tile=None):
    """SE_Block forward.  x_ncdhw: (N, C, D, H, W) -> (N, OC, D, H, W)."""
    N, C, D, H, W = x_ncdhw.shape
    S = D * H * W
    OC = wc.shape[0]
    conv_dtype = jnp.dtype(conv_dtype)

    x = x_ncdhw.reshape(N, C, S)  # metadata reshape only; no pad, no copy

    auto_tile, vmem_limit = _pick_tiles(C, OC, S, x.dtype.itemsize,
                                        conv_dtype.itemsize)
    s_tile = auto_tile if s_tile is None else min(int(s_tile), S)

    # Only fuse a downcast into the pool pass when the conv dtype is narrower
    # than the input dtype (e.g. f32 activations + bf16 conv path).
    cast_dtype = conv_dtype if conv_dtype.itemsize < x.dtype.itemsize else None

    # -- Pass 1: global average pool (Pallas; native-dtype reads, f32 acc). --
    sums, x_conv = _pool_pass(x, s_tile, vmem_limit, cast_dtype)
    means = sums / float(S)                                          # (N, C)

    # -- Tiny excitation MLP, batched over N (plain JAX, f32). --
    gate = jax.nn.sigmoid(jnp.maximum(means @ w1.T, 0.0) @ w2.T)     # (N, C)

    # -- Fold the SE gate into the conv weight: wc @ (x*g) == (wc*g) @ x. --
    wg = (wc[None, :, :].astype(jnp.float32)
          * gate[:, None, :]).astype(conv_dtype)                     # (N,OC,C)

    # -- Pass 2: streaming gated 1x1x1 conv (Pallas; f32 accumulate + bias). --
    out = _gated_conv(x_conv, wg, bc.reshape(OC, 1).astype(jnp.float32),
                      s_tile, vmem_limit, out_dtype=x_ncdhw.dtype)
    return out.reshape(N, OC, D, H, W)


# ---------------- Pure-JAX reference (matches the PyTorch forward) ----------

def se_block_ref(x, w1, w2, wc, bc):
    y = jnp.mean(x, axis=(2, 3, 4))                  # (N, C)
    y = jnp.maximum(y @ w1.T, 0.0)                   # (N, Cr)
    y = jax.nn.sigmoid(y @ w2.T)                     # (N, C)
    z = x * y[:, :, None, None, None]
    return jnp.einsum("oc,ncdhw->nodhw", wc, z) + bc[None, :, None, None, None]


if __name__ == "__main__":
    # Small shapes consistent with the module (reduction=16 requires C>=16).
    N, C, OC = 2, 32, 16
    D = H = W = 4
    reduction = 16
    Cr = C // reduction

    key = jax.random.PRNGKey(0)
    kx, k1, k2, k3, k4 = jax.random.split(key, 5)

    x = jax.random.normal(kx, (N, C, D, H, W), dtype=jnp.float32)
    # Synthetic parameters (shapes from SE_Block.__init__).
    w1 = jax.random.normal(k1, (Cr, C), dtype=jnp.float32) * 0.1   # fc[0].weight
    w2 = jax.random.normal(k2, (C, Cr), dtype=jnp.float32) * 0.1   # fc[2].weight
    wc = jax.random.normal(k3, (OC, C), dtype=jnp.float32) * 0.1   # cut.weight
    bc = jax.random.normal(k4, (OC,), dtype=jnp.float32) * 0.1     # cut.bias

    ref = se_block_ref(x, w1, w2, wc, bc)

    # f32 conv path (exact).
    out = jax.block_until_ready(se_block(x, w1, w2, wc, bc))
    assert out.shape == (N, OC, D, H, W)
    assert jnp.allclose(out, ref, atol=1e-4, rtol=1e-4)

    # bf16 conv path: the x downcast is fused into the pool pass; the conv
    # (HBM-bound everywhere) reads bf16 while accumulation/bias stay f32.
    out_bf16 = jax.block_until_ready(
        se_block(x, w1, w2, wc, bc, conv_dtype=jnp.bfloat16))
    assert jnp.allclose(out_bf16, ref, atol=5e-2, rtol=5e-2)

    # Ragged multi-tile path: S = 4*5*7 = 140 with a forced 128-wide tile ->
    # two spatial grid steps, a 12-column masked tail in the pool, and a
    # clipped partial output block in the conv.
    x2 = jax.random.normal(kx, (N, C, 4, 5, 7), dtype=jnp.float32)
    ref2 = se_block_ref(x2, w1, w2, wc, bc)
    out2 = jax.block_until_ready(se_block(x2, w1, w2, wc, bc, s_tile=128))
    assert out2.shape == (N, OC, 4, 5, 7)
    assert jnp.allclose(out2, ref2, atol=1e-4, rtol=1e-4)

    print("KERNEL_OK")
</pallas_src>

<mosaic_0001>
module attributes {stable_mosaic.version = 11 : i64} {
  func.func @_pool_kernel(%arg0: i32, %arg1: i32, %arg2: memref<1x32x64xf32, #tpu.memory_space<vmem>>, %arg3: memref<1x32x1xf32, #tpu.memory_space<vmem>>) attributes {dimension_semantics = [#tpu.dimension_semantics<parallel>, #tpu.dimension_semantics<arbitrary>], iteration_bounds = array<i64: 2, 1>, scalar_prefetch = 0 : i64, scratch_operands = 0 : i64, tpu.core_type = #tpu.core_type<tc>, window_params = [{transform_indices = @transform_0, window_bounds = array<i64: 1, 32, 64>}, {transform_indices = @transform_1, window_bounds = array<i64: 1, 32, 1>}]} {
    %c0 = arith.constant 0 : index
    %c0_0 = arith.constant 0 : index
    %c0_1 = arith.constant 0 : index
    %0 = vector.load %arg2[%c0, %c0_0, %c0_1] : memref<1x32x64xf32, #tpu.memory_space<vmem>>, vector<1x32x64xf32>
    %1 = vector.shape_cast %0 : vector<1x32x64xf32> to vector<32x64xf32>
    %c0_i32 = arith.constant 0 : i32
    %2 = arith.cmpi eq, %arg1, %c0_i32 : i32
    %3 = arith.extui %2 : i1 to i32
    %c0_i32_2 = arith.constant 0 : i32
    %4 = arith.cmpi ne, %3, %c0_i32_2 : i32
    scf.if %4 {
      %cst_9 = arith.constant 0.000000e+00 : f32
      %13 = vector.broadcast %cst_9 : f32 to vector<32x1xf32>
      %c0_10 = arith.constant 0 : index
      %c0_11 = arith.constant 0 : index
      %c0_12 = arith.constant 0 : index
      %14 = vector.load %arg3[%c0_10, %c0_11, %c0_12] : memref<1x32x1xf32, #tpu.memory_space<vmem>>, vector<1x32x1xf32>
      %15 = vector.shape_cast %14 : vector<1x32x1xf32> to vector<32x1xf32>
      %16 = vector.shape_cast %13 : vector<32x1xf32> to vector<1x32x1xf32>
      tpu.vector_store %arg3[%c0_10, %c0_11, %c0_12], %16 {strides = array<i32>} : memref<1x32x1xf32, #tpu.memory_space<vmem>>, vector<1x32x1xf32>,
    } else {
    }
    %c0_3 = arith.constant 0 : index
    %c0_4 = arith.constant 0 : index
    %c0_5 = arith.constant 0 : index
    %5 = vector.load %arg3[%c0_3, %c0_4, %c0_5] : memref<1x32x1xf32, #tpu.memory_space<vmem>>, vector<1x32x1xf32>
    %6 = vector.shape_cast %5 : vector<1x32x1xf32> to vector<32x1xf32>
    %cst = arith.constant dense<0.000000e+00> : vector<32xf32>
    %7 = vector.multi_reduction <add>, %1, %cst [1] : vector<32x64xf32> to vector<32xf32>
    %8 = vector.shape_cast %7 : vector<32xf32> to vector<32x1xf32>
    %9 = arith.addf %6, %8 : vector<32x1xf32>
    %c0_6 = arith.constant 0 : index
    %c0_7 = arith.constant 0 : index
    %c0_8 = arith.constant 0 : index
    %10 = vector.load %arg3[%c0_6, %c0_7, %c0_8] : memref<1x32x1xf32, #tpu.memory_space<vmem>>, vector<1x32x1xf32>
    %11 = vector.shape_cast %10 : vector<1x32x1xf32> to vector<32x1xf32>
    %12 = vector.shape_cast %9 : vector<32x1xf32> to vector<1x32x1xf32>
    tpu.vector_store %arg3[%c0_6, %c0_7, %c0_8], %12 {strides = array<i32>} : memref<1x32x1xf32, #tpu.memory_space<vmem>>, vector<1x32x1xf32>,
    return
  }
  func.func @transform_0(%arg0: i32, %arg1: i32) -> (i32, i32, i32) {
    %c0_i32 = arith.constant 0 : i32
    %c0_i32_0 = arith.constant 0 : i32
    return %arg0, %c0_i32, %arg1 : i32, i32, i32
  }
  func.func @transform_1(%arg0: i32, %arg1: i32) -> (i32, i32, i32) {
    %c0_i32 = arith.constant 0 : i32
    %c0_i32_0 = arith.constant 0 : i32
    %c0_i32_1 = arith.constant 0 : i32
    return %arg0, %c0_i32, %c0_i32_0 : i32, i32, i32
  }
}

module attributes {stable_mosaic.version = 11 : i64} {
  func.func @_conv_kernel(%arg0: i32, %arg1: i32, %arg2: memref<1x16x32xf32, #tpu.memory_space<vmem>>, %arg3: memref<1x32x64xf32, #tpu.memory_space<vmem>>, %arg4: memref<16x1xf32, #tpu.memory_space<vmem>>, %arg5: memref<1x16x64xf32, #tpu.memory_space<vmem>>) attributes {dimension_semantics = [#tpu.dimension_semantics<parallel>, #tpu.dimension_semantics<parallel>], iteration_bounds = array<i64: 2, 1>, scalar_prefetch = 0 : i64, scratch_operands = 0 : i64, tpu.core_type = #tpu.core_type<tc>, window_params = [{transform_indices = @transform_0, window_bounds = array<i64: 1, 16, 32>}, {transform_indices = @transform_1, window_bounds = array<i64: 1, 32, 64>}, {pipeline_mode = #tpu.pipeline_mode<synchronous>, transform_indices = @transform_2, window_bounds = array<i64: 16, 1>}, {transform_indices = @transform_3, window_bounds = array<i64: 1, 16, 64>}]} {
    %c0 = arith.constant 0 : index
    %c0_0 = arith.constant 0 : index
    %c0_1 = arith.constant 0 : index
    %0 = vector.load %arg2[%c0, %c0_0, %c0_1] : memref<1x16x32xf32, #tpu.memory_space<vmem>>, vector<1x16x32xf32>
    %1 = vector.shape_cast %0 : vector<1x16x32xf32> to vector<16x32xf32>
    %c0_2 = arith.constant 0 : index
    %c0_3 = arith.constant 0 : index
    %c0_4 = arith.constant 0 : index
    %2 = vector.load %arg3[%c0_2, %c0_3, %c0_4] : memref<1x32x64xf32, #tpu.memory_space<vmem>>, vector<1x32x64xf32>
    %3 = vector.shape_cast %2 : vector<1x32x64xf32> to vector<32x64xf32>
    %cst = arith.constant dense<0.000000e+00> : vector<16x64xf32>
    %4 = tpu.matmul %1, %3, %cst {dimension_numbers = #tpu.dot_dimension_numbers<[1], [0], [0], [1], [0, 0, 1, 1], [], []>} : vector<16x32xf32>, vector<32x64xf32>, vector<16x64xf32> -> vector<16x64xf32>
    %c0_5 = arith.constant 0 : index
    %c0_6 = arith.constant 0 : index
    %5 = vector.load %arg4[%c0_5, %c0_6] : memref<16x1xf32, #tpu.memory_space<vmem>>, vector<16x1xf32>
    %6 = vector.broadcast %5 : vector<16x1xf32> to vector<16x64xf32>
    %7 = arith.addf %4, %6 : vector<16x64xf32>
    %c0_7 = arith.constant 0 : index
    %c0_8 = arith.constant 0 : index
    %c0_9 = arith.constant 0 : index
    %8 = vector.load %arg5[%c0_7, %c0_8, %c0_9] : memref<1x16x64xf32, #tpu.memory_space<vmem>>, vector<1x16x64xf32>
    %9 = vector.shape_cast %8 : vector<1x16x64xf32> to vector<16x64xf32>
    %10 = vector.shape_cast %7 : vector<16x64xf32> to vector<1x16x64xf32>
    tpu.vector_store %arg5[%c0_7, %c0_8, %c0_9], %10 {strides = array<i32>} : memref<1x16x64xf32, #tpu.memory_space<vmem>>, vector<1x16x64xf32>,
    return
  }
  func.func @transform_0(%arg0: i32, %arg1: i32) -> (i32, i32, i32) {
    %c0_i32 = arith.constant 0 : i32
    %c0_i32_0 = arith.constant 0 : i32
    %c0_i32_1 = arith.constant 0 : i32
    return %arg0, %c0_i32, %c0_i32_0 : i32, i32, i32
  }
  func.func @transform_1(%arg0: i32, %arg1: i32) -> (i32, i32, i32) {
    %c0_i32 = arith.constant 0 : i32
    %c0_i32_0 = arith.constant 0 : i32
    return %arg0, %c0_i32, %arg1 : i32, i32, i32
  }
  func.func @transform_2(%arg0: i32, %arg1: i32) -> (i32, i32) {
    %c0_i32 = arith.constant 0 : i32
    %c0_i32_0 = arith.constant 0 : i32
    %c0_i32_1 = arith.constant 0 : i32
    return %c0_i32, %c0_i32_0 : i32, i32
  }
  func.func @transform_3(%arg0: i32, %arg1: i32) -> (i32, i32, i32) {
    %c0_i32 = arith.constant 0 : i32
    %c0_i32_0 = arith.constant 0 : i32
    return %arg0, %c0_i32, %arg1 : i32, i32, i32
  }
}

</mosaic_0001>

<bundles_post_ra>
// kernel: se_block.2
= control target key start
LH: loop header
LB: loop body
LE: loop exit
PB: predicated region body
PF: predicated region fallthrough
CT: control target
= control target key end

     0   :  { %s321_s6 = smov 0   ;;  %s323_s7 = smov 0   ;;  %s380_s0 = inlined_call_operand.vmem [shape: f32[2,32,64], index: 0, kind: input, shape index: {}]   ;;  %s381_s1 = inlined_call_operand.vmem [shape: f32[2,32,1], index: 1, kind: output, shape index: {}]  }
   0x1   :  { %s325_s8 = smov 0  }
   0x2 LB: > { %s23_s9 = sadd.s32 1, %s304_s7  ;;  %p252_p0 = scmp.ge.s32.totalorder %s308_s8, 1  ;;  %s308_s8 = sphi %s325_s8, %s11_s8   ;;  %s304_s7 = sphi %s323_s7, %s383_s7   ;;  %s300_s6 = sphi %s321_s6, %s382_s6  }
   0x3   : > { %p25_p1 = scmp.ge.s32.totalorder %s23_s9, 2  ;;  %p104_p2 = scmp.lt.s32.totalorder %s308_s8, 3 }
   0x5   : > { %s385_s9 = smov (%p25_p1, %s23_s9), 0  ;;  %p105_p3 = pnand %p252_p0, %p104_p2 }
   0x6   : > { %p127_p4 = scmp.lt.s32.totalorder (!%p105_p3), %s300_s6, 1 }
   0x7   : > { %108 = sbr.rel (%p105_p3) target bundleno = 145 (0x91), region = 24 }
   0xc   : > { %s387_s6 = smov (!%p127_p4, %s300_s6), 1  ;;  %vm148_vm0 = vcmask 7168   ;;  %vm157_vm1 = vcmask 523264   ;;  %v310_v2 = vmov 0.0  }
   0xd   : > { %s259_s10 = sshll.u32 %s387_s6, 5 }
   0xe   : > { %s134_s13 = scalar_lea.vmem %s380_s0, %s259_s10  ;;  %s345_s16 = scalar_lea.vmem %s381_s1, %s259_s10 }
   0xf   : > { %v142_v0 = vld [vmem:[%s134_s13 + $0x10] sm:$0xff]  ;;  %v140_v1 = vld [vmem:[%s134_s13] sm:$0xff]  ;;  %151 = vst.msk [vmem:[%s345_s16 + $0x10] sm:$0xff] %vm148_vm0, %v310_v2  ;;  %v143_v5 = vld [vmem:[%s134_s13 + $0x18] sm:$0xff] }
  0x10   : > { %v164_v3 = vsel %vm157_vm1, %v142_v0, 0.0  ;;  %v158_v4 = vsel %vm157_vm1, %v140_v1, 0.0  ;;  %149 = vst.msk [vmem:[%s345_s16] sm:$0xff] %vm148_vm0, %v310_v2  ;;  %v141_v6 = vld [vmem:[%s134_s13 + $0x8] sm:$0xff]  ;;  %v167_v7 = vsel %vm157_vm1, %v143_v5, 0.0 }
  0x11   : > { %165 = vadd.xlane.f32.xlu1 %v164_v3  ;;  %159 = vadd.xlane.f32.xlu0 %v158_v4  ;;  %150 = vst.msk [vmem:[%s345_s16 + $0x8] sm:$0xff] %vm148_vm0, %v310_v2  ;;  %v161_v8 = vsel %vm157_vm1, %v141_v6, 0.0 }
  0x12   : > { %152 = vst.msk [vmem:[%s345_s16 + $0x18] sm:$0xff] %vm148_vm0, %v310_v2 }
  0x16   : > { %v155_v9 = vld [vmem:[%s345_s16 + $0x10] sm:$0xff] }
  0x17   : > { %v153_v10 = vld [vmem:[%s345_s16] sm:$0xff] }
  0x18   : > { %v154_v16 = vld [vmem:[%s345_s16 + $0x8] sm:$0xff] }
  0x19   : > { %168 = vadd.xlane.f32.xlu1 %v167_v7  ;;  %162 = vadd.xlane.f32.xlu0 %v161_v8  ;;  %v156_v15 = vld [vmem:[%s345_s16 + $0x18] sm:$0xff] }
  0x84   : > { %v166_v11 = vpop.xlane.xlu1 %165  ;;  %v160_v12 = vpop.xlane.xlu0 %159 }
  0x85   : > { %v172_v13 = vadd.f32 %v166_v11, %v155_v9  ;;  %v170_v14 = vadd.f32 %v160_v12, %v153_v10 }
  0x87   : > { %177 = vst.msk [vmem:[%s345_s16 + $0x10] sm:$0xff] %vm148_vm0, %v172_v13 }
  0x88   : > { %175 = vst.msk [vmem:[%s345_s16] sm:$0xff] %vm148_vm0, %v170_v14 }
  0x8c   : > { %v169_v17 = vpop.xlane.xlu1 %168  ;;  %v163_v18 = vpop.xlane.xlu0 %162 }
  0x8d   : > { %v173_v19 = vadd.f32 %v169_v17, %v156_v15  ;;  %v171_v20 = vadd.f32 %v163_v18, %v154_v16 }
  0x8f   : > { %178 = vst.msk [vmem:[%s345_s16 + $0x18] sm:$0xff] %vm148_vm0, %v173_v19 }
  0x90   : > { %176 = vst.msk [vmem:[%s345_s16 + $0x8] sm:$0xff] %vm148_vm0, %v171_v20 }
  0x91 PF: > { %s11_s8 = sadd.s32 1, %s308_s8   ;;  %s382_s6 = smov %s304_s7 }
  0x92   : > { %p8_p5 = scmp.ge.s32.totalorder %s11_s8, 4   ;;  %s383_s7 = smov %s385_s9 }
  0x94   :  { %10 = sbr.rel (!%p8_p5) target bundleno = 2 (0x2), region = 58 }

// kernel: se_block.3
= control target key start
LH: loop header
LB: loop body
LE: loop exit
PB: predicated region body
PF: predicated region fallthrough
CT: control target
= control target key end

     0   :  { %s461_s12 = smov 0   ;;  %s463_s13 = smov 0   ;;  %s503_s0 = inlined_call_operand.vmem [shape: f32[2,16,32], index: 0, kind: input, shape index: {}]   ;;  %s504_s1 = inlined_call_operand.vmem [shape: f32[2,32,64], index: 1, kind: input, shape index: {}]   ;;  %s505_s2 = inlined_call_operand.vmem [shape: f32[16,1], index: 2, kind: input, shape index: {}]   ;;  %s506_s3 = inlined_call_operand.vmem [shape: f32[2,16,64], index: 3, kind: output, shape index: {}]  }
   0x1   :  { %s465_s14 = smov 0  }
   0x2 LB: > { %s25_s15 = sadd.s32 1, %s434_s13  ;;  %p372_p0 = scmp.ge.s32.totalorder %s438_s14, 1  ;;  %s438_s14 = sphi %s465_s14, %s13_s14   ;;  %s434_s13 = sphi %s463_s13, %s508_s13   ;;  %s430_s12 = sphi %s461_s12, %s507_s12  }
   0x3   : > { %p27_p1 = scmp.ge.s32.totalorder %s25_s15, 2  ;;  %p166_p2 = scmp.lt.s32.totalorder %s438_s14, 3 }
   0x5   : > { %s510_s15 = smov (%p27_p1, %s25_s15), 0  ;;  %p167_p3 = pnand %p372_p0, %p166_p2 }
   0x6   : > { %p201_p4 = scmp.lt.s32.totalorder (!%p167_p3), %s430_s12, 1 }
   0x7   : > { %170 = sbr.rel (%p167_p3) target bundleno = 153 (0x99), region = 32 }
   0xc   : > { %v228_v0 = vld [vmem:[%s505_s2] sm:$0xff]  ;;  %v440_v1 = vmov 0   ;;  %s512_s12 = smov (!%p201_p4, %s430_s12), 1  ;;  %v229_v4 = vld [vmem:[%s505_s2 + $0x8] sm:$0xff]  ;;  %vm240_vm0 = vcmask 261120   ;;  %vm270_vm1 = vcmask 523264  }
   0xd   : > { %415 = vset.pattern.permute.xlu0 %v440_v1  ;;  %s384_s18 = sshll.u32 %s512_s12, 5  ;;  %s383_s22 = sshll.u32 %s512_s12, 4 }
   0xe   : > { %232 = vperm.xlu0 %415, %v228_v0   ;;  %s213_s21 = scalar_lea.vmem %s504_s1, %s384_s18  ;;  %s205_s27 = scalar_lea.vmem %s503_s0, %s383_s22 }
   0xf   : > { %v227_v2 = vld [vmem:[%s213_s21 + $0x18] sm:$0xff]  ;;  %v226_v3 = vld [vmem:[%s213_s21 + $0x10] sm:$0xff]  ;;  %v225_v5 = vld [vmem:[%s213_s21 + $0x8] sm:$0xff]  ;;  %s221_s30 = scalar_lea.vmem %s506_s3, %s383_s22 }
  0x10   : > { %259 = vmatpush.msra.mxu0 %v227_v2  ;;  %386 = vmatpush.msra.mxu1 %v227_v2  ;;  %v224_v6 = vld [vmem:[%s213_s21] sm:$0xff]  ;;  %v223_v8 = vld [vmem:[%s205_s27 + $0x8] sm:$0xff] }
  0x11   : > { %v222_v7 = vld [vmem:[%s205_s27] sm:$0xff] }
  0x12   : > { %260 = vmatpush.msra.mxu0 %v226_v3  ;;  %387 = vmatpush.msra.mxu1 %v226_v3 }
  0x14   : > { %261 = vmatpush.msra.mxu0 %v225_v5  ;;  %388 = vmatpush.msra.mxu1 %v225_v5 }
  0x16   : > { %237 = vperm.xlu0 %415, %v229_v4   ;;  %262 = vmatpush.msra.mxu0 %v224_v6 }
  0x17   : > { %389 = vmatpush.msra.mxu1 %v224_v6  ;;  %379 = vmatmul.msk.f32.vlgmr.msra.gmra.mxu0 %vm240_vm0, %v222_v7 }
  0x18   : > { %380 = vmatmul.msk.f32.vlgmr.msra.gmra.mxu1 %vm240_vm0, %v223_v8 }
  0x80   : > { %v233_v9 = vpop.permute.xlu0 %232 }
  0x88   : > { %v238_v10 = vpop.permute.xlu0 %237 }
  0x94   : > { %v264_v11 = vpop.f32.mrf.mxu0 }
  0x95   : > { %v267_v12 = vpop.f32.mrf.mxu1  ;;  %v265_v13 = vadd.f32 %v264_v11, %v233_v9 }
  0x96   : > { %v268_v14 = vadd.f32 %v267_v12, %v238_v10 }
  0x97   : > { %271 = vst.msk [vmem:[%s221_s30] sm:$0xff] %vm270_vm1, %v265_v13 }
  0x98   : > { %272 = vst.msk [vmem:[%s221_s30 + $0x8] sm:$0xff] %vm270_vm1, %v268_v14 }
  0x99 PF: > { %s13_s14 = sadd.s32 1, %s438_s14   ;;  %s507_s12 = smov %s434_s13 }
  0x9a   : > { %p10_p5 = scmp.ge.s32.totalorder %s13_s14, 4   ;;  %s508_s13 = smov %s510_s15 }
  0x9c   :  { %12 = sbr.rel (!%p10_p5) target bundleno = 2 (0x2), region = 65 }

</bundles_post_ra>
